<compile_context>
chip_gen: v7x
topology: tpu7x:2x2x1
jax: 0.10.0
libtpu: 0.0.40
codegen_flags: <defaults>
</compile_context>

<pallas_src>
import functools

import jax
import jax.numpy as jnp
from jax.experimental import pallas as pl
from jax.experimental.pallas import tpu as pltpu


# ----------------------------------------------------------------------------
# Fused 'add' merge: for every input tensor, apply the 1x1 conv (+bias) if its
# channel count differs from the target, then sum everything — all inside one
# kernel, accumulating in f32 and storing the (Cout, TP) lane-dense tile once.
# ----------------------------------------------------------------------------
def _make_fused_add_kernel(conv_flags):
    n_x = len(conv_flags)

    def kernel(*refs):
        x_refs = refs[:n_x]            # each (Ci, TP)
        param_refs = refs[n_x:-1]      # (w, b) pairs for the conv'd inputs
        out_ref = refs[-1]             # (Cout, TP)

        acc = None
        pi = 0
        for i, has_conv in enumerate(conv_flags):
            x = x_refs[i][...]
            if has_conv:
                w = param_refs[pi][...]        # (Cout, Ci)
                b = param_refs[pi + 1][...]    # (Cout, 1)  broadcast over lanes
                pi += 2
                # W @ X with the pixel dim in lanes; f32 accumulation.
                term = jnp.dot(w, x, preferred_element_type=jnp.float32) + b
            else:
                term = x.astype(jnp.float32)
            acc = term if acc is None else acc + term

        out_ref[...] = acc.astype(out_ref.dtype)

    return kernel


def _pick_pixel_tile(hw, total_channels, itemsize,
                     max_tile=1024, vmem_budget=6 * 1024 * 1024):
    """Pick a lane-dense pixel tile: multiple of 128 dividing hw, capped so
    double-buffered input+output tiles stay within `vmem_budget` bytes."""
    if hw % 128 != 0:
        # Fall back to the full spatial extent (block dim == full array dim is
        # always a legal TPU tiling).
        return hw
    budget_tp = vmem_budget // (2 * max(total_channels, 1) * itemsize)
    tp = max(128, min(hw, max_tile, (budget_tp // 128) * 128))
    while hw % tp != 0:
        tp -= 128
    return tp


def merge_add_pallas(xs, params, target_channels, max_pixel_tile=1024):
    """Fused MergeBlock('add') forward.

    xs:     list of (N, Ci, H, W) arrays (NCHW).
    params: dict idx -> (W (target, Ci), b (target,)) for tensors whose Ci
            differs from target_channels.
    """
    N, _, H, W = xs[0].shape
    HW = H * W
    Cout = target_channels
    dtype = xs[0].dtype
    itemsize = jnp.dtype(dtype).itemsize

    conv_flags = [x.shape[1] != Cout for x in xs]
    total_channels = sum(x.shape[1] for x in xs) + Cout
    tp = _pick_pixel_tile(HW, total_channels, itemsize, max_tile=max_pixel_tile)

    # Free reshapes: (N, Ci, H, W) -> (N, Ci, H*W); no transposes anywhere.
    xs2 = [x.reshape(N, x.shape[1], HW) for x in xs]

    in_arrays = []
    in_specs = []
    for x2 in xs2:
        in_arrays.append(x2)
        in_specs.append(
            pl.BlockSpec((None, x2.shape[1], tp), lambda n, p: (n, 0, p)))
    for i, flag in enumerate(conv_flags):
        if flag:
            w, b = params[i]
            in_arrays.append(w)                              # (Cout, Ci)
            in_specs.append(pl.BlockSpec(w.shape, lambda n, p: (0, 0)))
            in_arrays.append(b.reshape(Cout, 1))             # (Cout, 1)
            in_specs.append(pl.BlockSpec((Cout, 1), lambda n, p: (0, 0)))

    out2 = pl.pallas_call(
        _make_fused_add_kernel(conv_flags),
        out_shape=jax.ShapeDtypeStruct((N, Cout, HW), dtype),
        grid=(N, HW // tp),
        in_specs=in_specs,
        out_specs=pl.BlockSpec((None, Cout, tp), lambda n, p: (n, 0, p)),
        compiler_params=pltpu.CompilerParams(
            dimension_semantics=("parallel", "parallel"),
            vmem_limit_bytes=32 * 1024 * 1024,
        ),
    )(*in_arrays)

    return out2.reshape(N, Cout, H, W)


# ----------------------------------------------------------------------------
# MergeBlock forward
# ----------------------------------------------------------------------------
def merge_block_forward(xs, policy, target_channels, params):
    """xs: list of (N, Ci, H, W) arrays.
    params: dict idx -> (W (target, Ci), b (target,)) for tensors with
            Ci != target_channels (only used by the 'add' policy).
    """
    if policy == "add":
        return merge_add_pallas(xs, params, target_channels)
    elif policy == "cat":
        # Pure data movement: a direct XLA HBM copy is faster than a Pallas
        # round-trip through VMEM on every TPU generation (per perf review).
        return jnp.concatenate(xs, axis=1)
    else:
        raise ValueError(
            "`merge_policy` must be one of: ['add', 'cat'], got {}".format(policy)
        )


if __name__ == "__main__":
    key = jax.random.PRNGKey(0)
    keys = jax.random.split(key, 16)

    N, H, W = 2, 16, 16
    target_channels = 8
    chans = [4, 8, 6]

    xs = [
        jax.random.normal(keys[i], (N, c, H, W), jnp.float32)
        for i, c in enumerate(chans)
    ]

    # Deterministic parameter init for the on-the-fly 1x1 convs
    # (PyTorch creates them with random init inside forward; here: fixed keys).
    params = {}
    for i, c in enumerate(chans):
        if c != target_channels:
            kw, kb = jax.random.split(keys[8 + i])
            bound = 1.0 / (c ** 0.5)
            w = jax.random.uniform(kw, (target_channels, c), jnp.float32, -bound, bound)
            b = jax.random.uniform(kb, (target_channels,), jnp.float32, -bound, bound)
            params[i] = (w, b)

    out_add = merge_block_forward(xs, "add", target_channels, params)
    out_cat = merge_block_forward(xs, "cat", target_channels, params)
    jax.block_until_ready(out_add)
    jax.block_until_ready(out_cat)

    # Pure-JAX reference check.
    ref_terms = []
    for i, x in enumerate(xs):
        if x.shape[1] != target_channels:
            w, b = params[i]
            t = jnp.einsum("nchw,oc->nohw", x, w) + b[None, :, None, None]
        else:
            t = x
        ref_terms.append(t)
    ref_add = functools.reduce(lambda a, b: a + b, ref_terms)
    ref_cat = jnp.concatenate(xs, axis=1)

    assert out_add.shape == (N, target_channels, H, W)
    assert out_cat.shape == (N, sum(chans), H, W)
    assert jnp.allclose(out_add, ref_add, atol=1e-4, rtol=1e-4)
    assert jnp.allclose(out_cat, ref_cat)

    print("KERNEL_OK")
</pallas_src>

<mosaic_0001>
module attributes {stable_mosaic.version = 11 : i64} {
  func.func @kernel(%arg0: i32, %arg1: i32, %arg2: memref<1x4x256xf32, #tpu.memory_space<vmem>>, %arg3: memref<1x8x256xf32, #tpu.memory_space<vmem>>, %arg4: memref<1x6x256xf32, #tpu.memory_space<vmem>>, %arg5: memref<8x4xf32, #tpu.memory_space<vmem>>, %arg6: memref<8x1xf32, #tpu.memory_space<vmem>>, %arg7: memref<8x6xf32, #tpu.memory_space<vmem>>, %arg8: memref<8x1xf32, #tpu.memory_space<vmem>>, %arg9: memref<1x8x256xf32, #tpu.memory_space<vmem>>) attributes {dimension_semantics = [#tpu.dimension_semantics<parallel>, #tpu.dimension_semantics<parallel>], iteration_bounds = array<i64: 2, 1>, scalar_prefetch = 0 : i64, scratch_operands = 0 : i64, tpu.core_type = #tpu.core_type<tc>, window_params = [{transform_indices = @transform_0, window_bounds = array<i64: 1, 4, 256>}, {transform_indices = @transform_1, window_bounds = array<i64: 1, 8, 256>}, {transform_indices = @transform_2, window_bounds = array<i64: 1, 6, 256>}, {pipeline_mode = #tpu.pipeline_mode<synchronous>, transform_indices = @transform_3, window_bounds = array<i64: 8, 4>}, {pipeline_mode = #tpu.pipeline_mode<synchronous>, transform_indices = @transform_4, window_bounds = array<i64: 8, 1>}, {pipeline_mode = #tpu.pipeline_mode<synchronous>, transform_indices = @transform_5, window_bounds = array<i64: 8, 6>}, {pipeline_mode = #tpu.pipeline_mode<synchronous>, transform_indices = @transform_6, window_bounds = array<i64: 8, 1>}, {transform_indices = @transform_7, window_bounds = array<i64: 1, 8, 256>}]} {
    %c0 = arith.constant 0 : index
    %c0_0 = arith.constant 0 : index
    %c0_1 = arith.constant 0 : index
    %0 = vector.load %arg2[%c0, %c0_0, %c0_1] : memref<1x4x256xf32, #tpu.memory_space<vmem>>, vector<1x4x256xf32>
    %1 = vector.shape_cast %0 : vector<1x4x256xf32> to vector<4x256xf32>
    %c0_2 = arith.constant 0 : index
    %c0_3 = arith.constant 0 : index
    %2 = vector.load %arg5[%c0_2, %c0_3] : memref<8x4xf32, #tpu.memory_space<vmem>>, vector<8x4xf32>
    %c0_4 = arith.constant 0 : index
    %c0_5 = arith.constant 0 : index
    %3 = vector.load %arg6[%c0_4, %c0_5] : memref<8x1xf32, #tpu.memory_space<vmem>>, vector<8x1xf32>
    %cst = arith.constant dense<0.000000e+00> : vector<8x256xf32>
    %4 = tpu.matmul %2, %1, %cst {dimension_numbers = #tpu.dot_dimension_numbers<[1], [0], [0], [1], [0, 0, 1, 1], [], []>} : vector<8x4xf32>, vector<4x256xf32>, vector<8x256xf32> -> vector<8x256xf32>
    %5 = vector.broadcast %3 : vector<8x1xf32> to vector<8x256xf32>
    %6 = arith.addf %4, %5 : vector<8x256xf32>
    %c0_6 = arith.constant 0 : index
    %c0_7 = arith.constant 0 : index
    %c0_8 = arith.constant 0 : index
    %7 = vector.load %arg3[%c0_6, %c0_7, %c0_8] : memref<1x8x256xf32, #tpu.memory_space<vmem>>, vector<1x8x256xf32>
    %8 = vector.shape_cast %7 : vector<1x8x256xf32> to vector<8x256xf32>
    %9 = arith.addf %6, %8 : vector<8x256xf32>
    %c0_9 = arith.constant 0 : index
    %c0_10 = arith.constant 0 : index
    %c0_11 = arith.constant 0 : index
    %10 = vector.load %arg4[%c0_9, %c0_10, %c0_11] : memref<1x6x256xf32, #tpu.memory_space<vmem>>, vector<1x6x256xf32>
    %11 = vector.shape_cast %10 : vector<1x6x256xf32> to vector<6x256xf32>
    %c0_12 = arith.constant 0 : index
    %c0_13 = arith.constant 0 : index
    %12 = vector.load %arg7[%c0_12, %c0_13] : memref<8x6xf32, #tpu.memory_space<vmem>>, vector<8x6xf32>
    %c0_14 = arith.constant 0 : index
    %c0_15 = arith.constant 0 : index
    %13 = vector.load %arg8[%c0_14, %c0_15] : memref<8x1xf32, #tpu.memory_space<vmem>>, vector<8x1xf32>
    %cst_16 = arith.constant dense<0.000000e+00> : vector<8x256xf32>
    %14 = tpu.matmul %12, %11, %cst_16 {dimension_numbers = #tpu.dot_dimension_numbers<[1], [0], [0], [1], [0, 0, 1, 1], [], []>} : vector<8x6xf32>, vector<6x256xf32>, vector<8x256xf32> -> vector<8x256xf32>
    %15 = vector.broadcast %13 : vector<8x1xf32> to vector<8x256xf32>
    %16 = arith.addf %14, %15 : vector<8x256xf32>
    %17 = arith.addf %9, %16 : vector<8x256xf32>
    %c0_17 = arith.constant 0 : index
    %c0_18 = arith.constant 0 : index
    %c0_19 = arith.constant 0 : index
    %18 = vector.load %arg9[%c0_17, %c0_18, %c0_19] : memref<1x8x256xf32, #tpu.memory_space<vmem>>, vector<1x8x256xf32>
    %19 = vector.shape_cast %18 : vector<1x8x256xf32> to vector<8x256xf32>
    %20 = vector.shape_cast %17 : vector<8x256xf32> to vector<1x8x256xf32>
    tpu.vector_store %arg9[%c0_17, %c0_18, %c0_19], %20 {strides = array<i32>} : memref<1x8x256xf32, #tpu.memory_space<vmem>>, vector<1x8x256xf32>,
    return
  }
  func.func @transform_0(%arg0: i32, %arg1: i32) -> (i32, i32, i32) {
    %c0_i32 = arith.constant 0 : i32
    %c0_i32_0 = arith.constant 0 : i32
    return %arg0, %c0_i32, %arg1 : i32, i32, i32
  }
  func.func @transform_1(%arg0: i32, %arg1: i32) -> (i32, i32, i32) {
    %c0_i32 = arith.constant 0 : i32
    %c0_i32_0 = arith.constant 0 : i32
    return %arg0, %c0_i32, %arg1 : i32, i32, i32
  }
  func.func @transform_2(%arg0: i32, %arg1: i32) -> (i32, i32, i32) {
    %c0_i32 = arith.constant 0 : i32
    %c0_i32_0 = arith.constant 0 : i32
    return %arg0, %c0_i32, %arg1 : i32, i32, i32
  }
  func.func @transform_3(%arg0: i32, %arg1: i32) -> (i32, i32) {
    %c0_i32 = arith.constant 0 : i32
    %c0_i32_0 = arith.constant 0 : i32
    %c0_i32_1 = arith.constant 0 : i32
    return %c0_i32, %c0_i32_0 : i32, i32
  }
  func.func @transform_4(%arg0: i32, %arg1: i32) -> (i32, i32) {
    %c0_i32 = arith.constant 0 : i32
    %c0_i32_0 = arith.constant 0 : i32
    %c0_i32_1 = arith.constant 0 : i32
    return %c0_i32, %c0_i32_0 : i32, i32
  }
  func.func @transform_5(%arg0: i32, %arg1: i32) -> (i32, i32) {
    %c0_i32 = arith.constant 0 : i32
    %c0_i32_0 = arith.constant 0 : i32
    %c0_i32_1 = arith.constant 0 : i32
    return %c0_i32, %c0_i32_0 : i32, i32
  }
  func.func @transform_6(%arg0: i32, %arg1: i32) -> (i32, i32) {
    %c0_i32 = arith.constant 0 : i32
    %c0_i32_0 = arith.constant 0 : i32
    %c0_i32_1 = arith.constant 0 : i32
    return %c0_i32, %c0_i32_0 : i32, i32
  }
  func.func @transform_7(%arg0: i32, %arg1: i32) -> (i32, i32, i32) {
    %c0_i32 = arith.constant 0 : i32
    %c0_i32_0 = arith.constant 0 : i32
    return %arg0, %c0_i32, %arg1 : i32, i32, i32
  }
}

</mosaic_0001>

<bundles_post_ra>
// kernel: tpu_custom_call.1
= control target key start
LH: loop header
LB: loop body
LE: loop exit
PB: predicated region body
PF: predicated region fallthrough
CT: control target
= control target key end

     0   :  { %12 = vsyncpa [#allocation3], 0  ;;  %s1045_s0 = inlined_call_operand.vmem [shape: f32[2,4,256], index: 0, kind: input, shape index: {}]   ;;  %s1046_s1 = inlined_call_operand.vmem [shape: f32[2,8,256], index: 1, kind: input, shape index: {}]   ;;  %s1047_s2 = inlined_call_operand.vmem [shape: f32[2,6,256], index: 2, kind: input, shape index: {}]   ;;  %s1048_s3 = inlined_call_operand.vmem [shape: f32[8,4], index: 3, kind: input, shape index: {}]   ;;  %s1049_s4 = inlined_call_operand.vmem [shape: f32[8,1], index: 4, kind: input, shape index: {}]   ;;  %s1050_s5 = inlined_call_operand.vmem [shape: f32[8,6], index: 5, kind: input, shape index: {}]   ;;  %s1051_s6 = inlined_call_operand.vmem [shape: f32[8,1], index: 6, kind: input, shape index: {}]   ;;  %s1052_s7 = inlined_call_operand.hbm [shape: f32[2,8,256], index: 7, kind: output, shape index: {}]  }
   0x1   :  { %14 = vsyncpa [#allocation3 + $0x1], 0  ;;  %s915_s24 = smov 0   ;;  %s917_s25 = smov 0  }
   0x2   :  { %s919_s26 = smov 0   ;;  %s921_s27 = smov 0  }
   0x3   :  { %s923_s28 = smov 0   ;;  %s925_s29 = smov 0  }
   0x4 LB: > { %s698_s30 = sadd.s32 4294967295, %s870_s29   ;;  %s699_s8 = sadd.s32 4294967294, %s870_s29   ;;  %s870_s29 = sphi %s925_s29, %s20_s29   ;;  %s866_s28 = sphi %s923_s28, %s1059_s28   ;;  %s862_s27 = sphi %s921_s27, %s1058_s27   ;;  %s858_s26 = sphi %s919_s26, %s1057_s26   ;;  %s854_s25 = sphi %s917_s25, %s1056_s25   ;;  %s850_s24 = sphi %s915_s24, %s1055_s24  }
   0x5   : > { %s32_s9 = sadd.s32 1, %s866_s28  ;;  %s209_s10 = sadd.s32 1, %s858_s26 }
   0x6   : > { %p34_p0 = scmp.ge.s32.totalorder %s32_s9, 2  ;;  %p219_p1 = scmp.ne.s32.totalorder %s858_s26, %s854_s25 }
   0x7   : > { %p220_p2 = scmp.eq.s32.totalorder %s698_s30, 1  ;;  %p225_p3 = scmp.ne.s32.totalorder %s854_s25, %s850_s24 }
   0x8   : > { %s1061_s9 = smov (%p34_p0, %s32_s9), 0  ;;  %p226_p5 = scmp.eq.s32.totalorder %s699_s8, 1 }
   0x9   : > { %p955_p4 = por %p220_p2, %p219_p1  ;;  %s204_s12 = ssub.s32 %s866_s28, %s1061_s9 }
   0xa   : > { %p702_p6 = scmp.ge.s32.totalorder %s870_s29, 1  ;;  %p207_p7 = scmp.eq.s32.totalorder %s204_s12, 0 }
   0xb   : > { %p962_p8 = por %p226_p5, %p225_p3  ;;  %p295_p9 = scmp.lt.s32.totalorder %s870_s29, 3 }
   0xc   : > { %s968_s14 = scalar_select %p207_p7, %s858_s26, %s209_s10  }
   0xd   : > { %p296_p10 = pnand %p702_p6, %p295_p9 }
   0xe   : > { %p350_p11 = scmp.lt.s32.totalorder (!%p296_p10), %s862_s27, 1  ;;  %v872_v0 = vmov (!%p296_p10), 0.0   ;;  %v382_v1 = vld [vmem:[%s1049_s4] sm:$0xff] (!%p296_p10)  ;;  %v873_v2 = vmov (!%p296_p10), 0   ;;  %vm487_vm0 = vcmask (!%p296_p10), 1045504   ;;  %vm394_vm1 = vcmask (!%p296_p10), 1043456  }
   0xf   : > { %299 = sbr.rel (%p296_p10) target bundleno = 266 (0x10a), region = 48  ;;  %463 = vmatprep.mubr.f32.mxu1 (!%p296_p10), %v872_v0  ;;  %558 = vmatprep.mubr.f32.mxu0 (!%p296_p10), %v872_v0  ;;  %v477_v3 = vld [vmem:[%s1051_s6] sm:$0xff] (!%p296_p10)  ;;  %vm483_vm2 = vcmask (!%p296_p10), 48128   ;;  %vm390_vm3 = vcmask (!%p296_p10), 31744   ;;  %s724_s8 = sshll.u32 (!%p296_p10), %s862_s27, 8 }
  0x10   : > { %790 = vset.pattern.permute.xlu0 (!%p296_p10), %v873_v2  ;;  %v476_v8 = vld [vmem:[%s1050_s5] sm:$0xff] (!%p296_p10)  ;;  %s998_s16 = scalar_lea.hbm (!%p296_p10), %s1052_s7, %s724_s8 }
  0x11   : > { %385 = vperm.xlu0 (!%p296_p10), %790, %v382_v1   ;;  %v381_v9 = vld [vmem:[%s1048_s3] sm:$0xff] (!%p296_p10) }
  0x15   : > { %480 = vperm.xlu0 (!%p296_p10), %790, %v477_v3  }
  0x16   : > { %s351_s17 = scalar_select %p350_p11, %s862_s27, 1 }
  0x17   : > { %s874_s27 = smov [#allocation2]  }
  0x18   : > { %s721_s18 = sshll.u32 %s351_s17, 3  ;;  %s722_s19 = sshll.u32 %s351_s17, 4 }
  0x19   : > { %s357_s30 = scalar_lea.vmem %s1045_s0, %s721_s18  ;;  %s377_s12 = scalar_lea.vmem %s1047_s2, %s722_s19 }
  0x1a   : > { %v380_v4 = vld [vmem:[%s357_s30] sm:$0xff]  ;;  %v475_v6 = vld [vmem:[%s377_s12 + $0x8] sm:$0x3f]  ;;  %s346_s18 = sand.u32 1, %s854_s25   ;;  %s367_s23 = scalar_lea.vmem %s1046_s1, %s722_s19 }
  0x1b   : > { %v389_v5 = vcombine.high %v380_v4, %v380_v4  ;;  %v474_v7 = vld [vmem:[%s377_s12] sm:$0x3f]  ;;  %713 = vmatprep.subr.msk.mxu0 %vm487_vm0, %v475_v6  ;;  %s703_s30 = sshll.u32 %s346_s18, 4  ;;  %v471_v17 = vld [vmem:[%s367_s23 + $0x8] sm:$0xff]  ;;  %s570_s17 = scalar_lea.sflag [#allocation3], %s346_s18 }
  0x1c   : > { %714 = vmatpush1.msk.msra.mxu0 %vm487_vm0, %v474_v7  ;;  %v470_v13 = vld [vmem:[%s367_s23] sm:$0xff]  ;;  %s348_s10 = scalar_lea.vmem [#allocation2], %s703_s30  ;;  %s796_s21 = sshll.u32 %s874_s27, 4  ;;  %s797_s21 = int_to_ptr.vmem [resolvable:$false] %s796_s21 }
  0x1d   : > { %710 = vmatprep.subr.msk.mxu1 %vm394_vm1, %v389_v5  ;;  %715 = vmatmul.mubr.msk.f32.vlgmr.msra.gmra.mrb[0].mxu0 %vm483_vm2, %v476_v8  ;;  %s586_s12 = sshll.u32 %s348_s10, 4  ;;  %s798_s22 = scalar_lea.vmem %s797_s21, 512  ;;  %s1000_s12 = int_to_ptr.vmem [resolvable:$true] %s586_s12 }
  0x1e   : > { %711 = vmatpush1.msk.msra.mxu1 %vm394_vm1, %v380_v4  ;;  %s792_s20 = scalar_lea.vmem %s1000_s12, 256  ;;  %p799_p1 = scmp.lt.s32.totalorder %s1000_s12, %s797_s21 }
  0x1f   : > { %712 = vmatmul.mubr.msk.f32.vlgmr.msra.gmra.mrb[0].mxu1 %vm390_vm3, %v381_v9  ;;  %p793_p12 = scmp.ne.s32.totalorder %s1000_s12, %s792_s20  ;;  %p800_p2 = scmp.lt.s32.totalorder %s798_s22, %s792_s20 }
  0x21   : > { %p794_p13 = pnand %p793_p12, %p955_p4  ;;  %p801_p3 = por %p800_p2, %p799_p1 }
  0x23   : > { %p795_p0 = pneg %p794_p13 }
  0x25   : > { %p802_p5 = pnand %p801_p3, %p795_p0 }
  0x90   : > { %v386_v10 = vpop.permute.xlu0 %385 }
  0x94   : > { %v481_v20 = vpop.permute.xlu0 %480 }
  0xf0   : > { %v560_v11 = vpop.f32.mrb[0].mxu0 }
  0xf1   : > { %v562_v14 = vpop.f32.mrb[1].mxu0 }
  0xf2   : > { %v465_v12 = vpop.f32.mrb[0].mxu1 }
  0xf3   : > { %v466_v15 = vadd.f32 %v465_v12, %v386_v10  ;;  %v467_v16 = vpop.f32.mrb[1].mxu1 }
  0xf4   : > { %v468_v18 = vadd.f32 %v467_v16, %v386_v10 }
  0xf5   : > { %v472_v19 = vadd.f32 %v470_v13, %v466_v15 }
  0xf6   : > { %v473_v21 = vadd.f32 %v471_v17, %v468_v18 }
  0xf7   : > { %v727_v22 = vadd.f32 %v481_v20, %v472_v19 }
  0xf8   : > { %v731_v23 = vadd.f32 %v481_v20, %v473_v21 }
  0xf9   : > { %v728_v24 = vadd.f32 %v727_v22, %v560_v11 }
  0xfa   : > { %v732_v25 = vadd.f32 %v731_v23, %v562_v14 }
  0xfb   : > { %567 = vst [vmem:[%s348_s10] sm:$0xff] %v728_v24 }
  0xfc   : > { %568 = vst [vmem:[%s348_s10 + $0x8] sm:$0xff] %v732_v25 }
  0xfd   : > { %805 = shalt.err (!%p802_p5)
}
  0xfe   : > { %s806_s18 = scalar_lea.hbm %s998_s16, 256  ;;  %s810_s8 = scalar_lea.hbm %s1052_s7, 512 }
  0xff   : > { %p807_p6 = scmp.ne.s32.totalorder %s998_s16, %s806_s18  ;;  %p811_p10 = scmp.lt.u32.totalorder %s998_s16, %s1052_s7 }
 0x100   : > { %p812_p11 = scmp.lt.u32.totalorder %s810_s8, %s806_s18  ;;  %p814_p13 = scmp.lt.u32.totalorder %s806_s18, %s998_s16 }
 0x101   : > { %p808_p7 = pnand %p807_p6, %p955_p4 }
 0x102   : > { %p813_p12 = por %p812_p11, %p811_p10 }
 0x103   : > { %p809_p9 = pneg %p808_p7 }
 0x104   : > { %p815_p0 = por %p814_p13, %p813_p12 }
 0x106   : > { %p816_p1 = pnand %p815_p0, %p809_p9 }
 0x108   : > { %819 = shalt.err (!%p816_p1)
}
 0x109   : > { %733 = dma.vmem_to_hbm [thread:$0]  (%p955_p4), %s1000_s12, 256, %s998_s16, %s570_s17  }
 0x10a PF: > { %p739_p2 = scmp.ge.s32.totalorder %s870_s29, 2  ;;  %s598_s15 = sand.u32 1, %s850_s24  }
 0x10b   : > { %s599_s20 = scalar_lea.sflag [#allocation3], %s598_s15 }
 0x10c   : > { %p736_p3 = pnand %p739_p2, %p962_p8 }
 0x10e   : > { %845 = dma.done.wait (!%p736_p3), %s599_s20, 256  }
 0x10f   : > { %847 = vsyncadd (!%p736_p3), %s599_s20, 4294967040  ;;  %s20_s29 = sadd.s32 1, %s870_s29   ;;  %s1055_s24 = smov %s854_s25 }
 0x110   : > { %p17_p5 = scmp.ge.s32.totalorder %s20_s29, 4   ;;  %s1056_s25 = smov %s858_s26 }
 0x111   : > { %s1057_s26 = smov %s968_s14  ;;  %s1058_s27 = smov %s866_s28 }
 0x112   : > { %s1059_s28 = smov %s1061_s9  ;;  %19 = sbr.rel (!%p17_p5) target bundleno = 4 (0x4), region = 89 }
 0x119   :  { %604 = vsyncpa [#allocation3], 1 }
 0x11a   :  { %606 = vsyncpa [#allocation3 + $0x1], 1 }

</bundles_post_ra>
